<compile_context>
chip_gen: v7x
topology: tpu7x:2x2x1
jax: 0.10.0
libtpu: 0.0.40
codegen_flags: <defaults>
</compile_context>

<pallas_src>
import jax
import jax.numpy as jnp
from jax.experimental import pallas as pl
from jax.experimental.pallas import tpu as pltpu


def _round_up(n, m):
    return ((n + m - 1) // m) * m


def _pad2(a, rows, cols, dtype):
    out = jnp.zeros((rows, cols), dtype)
    return out.at[:a.shape[0], :a.shape[1]].set(a.astype(dtype))


def _vmem_capacity_bytes():
    """Physical VMEM per TensorCore; conservative fallback = v7x's 64 MiB."""
    try:
        info = pltpu.get_tpu_info()
        return int(getattr(info, "vmem_capacity_bytes", 64 * 1024 * 1024))
    except Exception:
        return 64 * 1024 * 1024


def _vmem_resident():
    """Whole-array-in-VMEM spec: single buffer, loaded once, never re-DMA'd."""
    return pl.BlockSpec(memory_space=pltpu.MemorySpace.VMEM)


def masked_omics_kernel(
    x_ref,      # [TB, TK]            bf16  (batch tile, D_in strip)
    w1_ref,     # [TK, H1p]           bf16  (mask_1 pre-folded)
    b1_ref,     # [1, H1p]            f32   (VMEM resident)
    w2_ref,     # [T1, 128, CT] or [H1p, H2p]  bf16 (mask_2 pre-folded)
    b2_ref,     # [1, H2p]            f32
    wl1_ref,    # [H2p, Hhp]          bf16
    bl1_ref,    # [1, Hhp]            f32
    wl2_ref,    # [Hhp, Cp]           bf16
    bl2_ref,    # [1, Cp]             f32
    out_ref,    # [TB, Cp]            f32
    acc_ref,    # [TB, H1p]           f32 scratch: fc1 accumulator across K
):
    k = pl.program_id(1)

    @pl.when(k == 0)
    def _():
        acc_ref[...] = jnp.zeros_like(acc_ref)

    # Partial fc1: accumulate x-strip @ W1-strip on the MXU (f32 accumulate).
    acc_ref[...] += jnp.dot(
        x_ref[...], w1_ref[...], preferred_element_type=jnp.float32)

    # On the last K step finish fc1 (bias) and run fc2 + classification head
    # against the single-buffered VMEM-resident weights.
    @pl.when(k == pl.num_programs(1) - 1)
    def _():
        out1 = (acc_ref[...] + b1_ref[...]).astype(jnp.bfloat16)

        if w2_ref.ndim == 3:
            # Block-diagonal fc2: only the diagonal 128-row super-tiles exist;
            # tile t maps out1[:, t*128:(t+1)*128] to out2[:, t*ct:(t+1)*ct]
            # (off-diagonal blocks of mask_2 are exactly zero).
            t1, rows, _ = w2_ref.shape
            parts = [
                jnp.dot(out1[:, t * rows:(t + 1) * rows], w2_ref[t],
                        preferred_element_type=jnp.float32)
                for t in range(t1)
            ]
            out2 = parts[0] if t1 == 1 else jnp.concatenate(parts, axis=-1)
        else:
            out2 = jnp.dot(out1, w2_ref[...],
                           preferred_element_type=jnp.float32)
        out2 = out2 + b2_ref[...]

        h = jnp.dot(out2.astype(jnp.bfloat16), wl1_ref[...],
                    preferred_element_type=jnp.float32) + bl1_ref[...]
        h = jnp.maximum(h, 0.0)     # ReLU; Dropout = identity at inference
        logits = jnp.dot(h.astype(jnp.bfloat16), wl2_ref[...],
                         preferred_element_type=jnp.float32) + bl2_ref[...]
        out_ref[...] = logits.astype(out_ref.dtype)


def _select_tiling(B, Dp, H1p, H2p, Hhp, Cp, resident_bytes, vmem_cap):
    """Pick (tile_b, tk) from the device's VMEM budget."""
    budget = max(int(vmem_cap * 0.85) - resident_bytes, 4 << 20)

    # K tile: largest multiple of 128 that divides Dp (no padded W1 columns
    # are streamed), capped by a generation-dependent target and the budget.
    tk_target = 2048 if vmem_cap >= (96 << 20) else 1024
    m = Dp // 128

    def largest_dividing(limit):
        t = max(1, min(limit, m))
        while m % t:
            t -= 1
        return 128 * t

    tk = largest_dividing(tk_target // 128)
    while 2 * tk * H1p * 2 > budget // 2 and tk > 128:  # double-buffered W1 strip
        tk = largest_dividing(tk // 128 - 1)

    # Batch tile: prefer a single batch tile (each extra batch tile re-streams
    # W1, the dominant HBM term); round to 16 rows for bf16 sublane packing.
    def per_tile_bytes(tb):
        return (2 * tb * tk * 2                 # x strips (bf16, 2 buffers)
                + 2 * tb * Cp * 4               # out blocks (f32, 2 buffers)
                + tb * H1p * 4                  # fc1 accumulator scratch
                + tb * (H1p * 2 + H2p * 6 + Hhp * 6 + Cp * 4))  # epilogue temps

    w1_strip = 2 * tk * H1p * 2
    bp16 = _round_up(max(B, 1), 16)
    candidates = ([bp16] if bp16 <= 512 else []) + [512, 256, 128, 64, 32, 16]
    tile_b = 16
    for tb in candidates:
        if w1_strip + per_tile_bytes(tb) <= budget:
            tile_b = tb
            break
    return tile_b, tk


def masked_omics_forward(x, p):
    """x: [B, input_dim] float32; p: dict from prep_params (padded, bf16)."""
    B, D = x.shape
    num_classes = p["num_classes"]
    Dp, H1p = p["fc1_w"].shape
    if p["fc2_w"].ndim == 3:
        t1, _, ct = p["fc2_w"].shape
        H2p = t1 * ct
    else:
        H2p = p["fc2_w"].shape[1]
    Hhp = p["head1_w"].shape[1]
    Cp = p["head2_w"].shape[1]

    vmem_cap = _vmem_capacity_bytes()
    resident_bytes = (
        p["fc2_w"].size * 2 + p["head1_w"].size * 2 + p["head2_w"].size * 2
        + (H1p + H2p + Hhp + Cp) * 4)
    tile_b, tk = _select_tiling(B, Dp, H1p, H2p, Hhp, Cp,
                                resident_bytes, vmem_cap)

    Bp = _round_up(B, tile_b)
    x_pad = jnp.zeros((Bp, Dp), jnp.bfloat16).at[:B, :D].set(
        x.astype(jnp.bfloat16))

    grid = (Bp // tile_b, Dp // tk)
    b_tiles = grid[0]

    flops = (2 * Bp * Dp * H1p                 # fc1
             + 2 * Bp * p["fc2_w"].size // 1   # fc2 (block-diag or dense)
             + 2 * Bp * (H2p * Hhp + Hhp * Cp))
    bytes_accessed = (
        b_tiles * Dp * H1p * 2                              # W1 per batch tile
        + Bp * Dp * 2                                       # x
        + (p["fc2_w"].size + p["head1_w"].size + p["head2_w"].size) * 2
        + (H1p + H2p + Hhp + Cp) * 4                        # biases
        + Bp * Cp * 4)                                      # output

    # VMEM footprint estimate, incl. epilogue intermediates, clamped to HW.
    vmem_est = (resident_bytes
                + 2 * tk * H1p * 2                          # W1 strips (2 bufs)
                + 2 * tile_b * tk * 2                       # x strips (2 bufs)
                + 2 * tile_b * Cp * 4                       # out blocks (2 bufs)
                + tile_b * H1p * 4                          # fc1 accumulator
                + tile_b * (H1p * 2 + H2p * 6 + Hhp * 6 + Cp * 4))
    vmem_limit = int(max(min(vmem_cap - (8 << 20), vmem_est + (8 << 20)),
                         16 << 20))

    out_pad = pl.pallas_call(
        masked_omics_kernel,
        out_shape=jax.ShapeDtypeStruct((Bp, Cp), jnp.float32),
        grid_spec=pltpu.PrefetchScalarGridSpec(
            num_scalar_prefetch=0,
            grid=grid,
            in_specs=[
                pl.BlockSpec((tile_b, tk), lambda b, k: (b, k)),   # x strip
                pl.BlockSpec((tk, H1p), lambda b, k: (k, 0)),      # W1 strip
                _vmem_resident(),   # b1       (single-buffered, resident)
                _vmem_resident(),   # W2 diagonal super-tiles
                _vmem_resident(),   # b2
                _vmem_resident(),   # head1_w
                _vmem_resident(),   # head1_b
                _vmem_resident(),   # head2_w
                _vmem_resident(),   # head2_b
            ],
            out_specs=pl.BlockSpec((tile_b, Cp), lambda b, k: (b, 0)),
            scratch_shapes=[pltpu.VMEM((tile_b, H1p), jnp.float32)],
        ),
        compiler_params=pltpu.CompilerParams(
            dimension_semantics=("parallel", "arbitrary"),
            vmem_limit_bytes=vmem_limit,
        ),
        cost_estimate=pl.CostEstimate(
            flops=int(flops), transcendentals=0,
            bytes_accessed=int(bytes_accessed)),
    )(x_pad, p["fc1_w"], p["fc1_b"], p["fc2_w"], p["fc2_b"],
      p["head1_w"], p["head1_b"], p["head2_w"], p["head2_b"])

    return out_pad[:B, :num_classes]


def init_raw_params(key, input_dim, num_pathways, dim_per_path_1,
                    dim_per_path_2, num_classes):
    """Synthetic f32 parameters matching MaskedOmics.__init__ shapes.

    Weights are stored [in_features, out_features] (transpose of nn.Linear)."""
    H1 = dim_per_path_1 * num_pathways
    H2 = dim_per_path_2 * num_pathways
    Hh = H2 // 4
    keys = jax.random.split(key, 9)

    def xavier_normal(k, fan_in, fan_out):
        std = jnp.sqrt(2.0 / (fan_in + fan_out))
        return std * jax.random.normal(k, (fan_in, fan_out), dtype=jnp.float32)

    # df_comp: binary pathway-membership matrix [input_dim, num_pathways]
    df_comp = (jax.random.uniform(keys[0], (input_dim, num_pathways)) < 0.3
               ).astype(jnp.float32)
    mask_1 = jnp.repeat(df_comp, dim_per_path_1, axis=1)          # [D_in, H1]
    mask_2 = jnp.kron(jnp.eye(num_pathways, dtype=jnp.float32),
                      jnp.ones((dim_per_path_1, dim_per_path_2), jnp.float32))

    return dict(
        mask_1=mask_1,
        mask_2=mask_2,
        fc1_w=xavier_normal(keys[1], input_dim, H1),
        fc1_b=jax.random.uniform(keys[2], (1, H1), dtype=jnp.float32),
        fc2_w=xavier_normal(keys[3], H1, H2),
        fc2_b=jax.random.uniform(keys[4], (1, H2), dtype=jnp.float32),
        head1_w=xavier_normal(keys[5], H2, Hh),
        head1_b=jax.random.uniform(keys[6], (1, Hh), minval=-0.1, maxval=0.1,
                                   dtype=jnp.float32),
        head2_w=xavier_normal(keys[7], Hh, num_classes),
        head2_b=jax.random.uniform(keys[8], (1, num_classes), minval=-0.1,
                                   maxval=0.1, dtype=jnp.float32),
        num_classes=num_classes,
        dim_per_path_1=dim_per_path_1,
        dim_per_path_2=dim_per_path_2,
        num_pathways=num_pathways,
    )


def prep_params(raw):
    """Inference-time prep: fold masks into weights, exploit fc2's
    block-diagonal structure, cast to bf16, pad to hardware tiles."""
    D, H1 = raw["fc1_w"].shape
    H2 = raw["fc2_w"].shape[1]
    Hh = raw["head1_w"].shape[1]
    C = raw["head2_w"].shape[1]
    d1 = int(raw["dim_per_path_1"])
    d2 = int(raw["dim_per_path_2"])

    Dp = _round_up(D, 128)          # D padded to lanes; tk later divides Dp
    H1p = _round_up(H1, 128)
    Hhp = _round_up(Hh, 128)
    Cp = _round_up(C, 128)

    # Masks are constant at inference -> fold once; never DMA'd per call.
    w1 = raw["fc1_w"] * raw["mask_1"]
    w2 = raw["fc2_w"] * raw["mask_2"]

    # mask_2 is block-diagonal (one [d1, d2] block per pathway).  Group
    # pathways into 128-row MXU super-tiles and keep only the diagonal
    # super-tiles -> W2 stored as [n_tiles, 128, ct], ct = (128 // d1) * d2.
    rows = 128
    use_blockdiag = (rows % d1 == 0) and (((rows // d1) * d2) % 128 == 0)
    if use_blockdiag:
        t1 = H1p // rows
        ct = (rows // d1) * d2
        H2p = t1 * ct
        w2_full = _pad2(w2, H1p, H2p, jnp.float32)
        fc2_w = jnp.stack(
            [w2_full[t * rows:(t + 1) * rows, t * ct:(t + 1) * ct]
             for t in range(t1)]).astype(jnp.bfloat16)
    else:
        H2p = _round_up(H2, 128)
        fc2_w = _pad2(w2, H1p, H2p, jnp.bfloat16)

    return dict(
        fc1_w=_pad2(w1, Dp, H1p, jnp.bfloat16),
        fc1_b=_pad2(raw["fc1_b"], 1, H1p, jnp.float32),
        fc2_w=fc2_w,
        fc2_b=_pad2(raw["fc2_b"], 1, H2p, jnp.float32),
        head1_w=_pad2(raw["head1_w"], H2p, Hhp, jnp.bfloat16),
        head1_b=_pad2(raw["head1_b"], 1, Hhp, jnp.float32),
        head2_w=_pad2(raw["head2_w"], Hhp, Cp, jnp.bfloat16),
        head2_b=_pad2(raw["head2_b"], 1, Cp, jnp.float32),
        num_classes=raw["num_classes"],
    )


def reference_forward(x, raw):
    """Pure-JAX reference with the same bf16-weight / f32-accumulate math."""
    w1 = (raw["fc1_w"] * raw["mask_1"]).astype(jnp.bfloat16)
    w2 = (raw["fc2_w"] * raw["mask_2"]).astype(jnp.bfloat16)
    out1 = jnp.dot(x.astype(jnp.bfloat16), w1,
                   preferred_element_type=jnp.float32) + raw["fc1_b"]
    out2 = jnp.dot(out1.astype(jnp.bfloat16), w2,
                   preferred_element_type=jnp.float32) + raw["fc2_b"]
    h = jnp.dot(out2.astype(jnp.bfloat16), raw["head1_w"].astype(jnp.bfloat16),
                preferred_element_type=jnp.float32) + raw["head1_b"]
    h = jnp.maximum(h, 0.0)
    return jnp.dot(h.astype(jnp.bfloat16), raw["head2_w"].astype(jnp.bfloat16),
                   preferred_element_type=jnp.float32) + raw["head2_b"]


if __name__ == "__main__":
    # Small shapes consistent with the module's structure.
    B = 2
    input_dim = 64
    num_pathways = 8
    dim_per_path_1 = 8
    dim_per_path_2 = 16
    num_classes = 4

    key = jax.random.PRNGKey(0)
    k_x, k_p = jax.random.split(key)

    raw = init_raw_params(k_p, input_dim, num_pathways, dim_per_path_1,
                          dim_per_path_2, num_classes)
    params = prep_params(raw)
    x = jax.random.normal(k_x, (B, input_dim), dtype=jnp.float32)

    logits = masked_omics_forward(x, params)
    logits = jax.block_until_ready(logits)

    ref = reference_forward(x, raw)
    assert logits.shape == (B, num_classes)
    assert jnp.allclose(logits, ref, atol=2e-2, rtol=2e-2), "mismatch vs reference"

    print("KERNEL_OK")
</pallas_src>

<mosaic_0001>
module attributes {stable_mosaic.version = 11 : i64} {
  func.func @masked_omics_kernel(%arg0: i32, %arg1: i32, %arg2: memref<16x128xbf16, #tpu.memory_space<vmem>>, %arg3: memref<128x128xbf16, #tpu.memory_space<vmem>>, %arg4: memref<1x128xf32, #tpu.memory_space<vmem>>, %arg5: memref<1x128x256xbf16, #tpu.memory_space<vmem>>, %arg6: memref<1x256xf32, #tpu.memory_space<vmem>>, %arg7: memref<256x128xbf16, #tpu.memory_space<vmem>>, %arg8: memref<1x128xf32, #tpu.memory_space<vmem>>, %arg9: memref<128x128xbf16, #tpu.memory_space<vmem>>, %arg10: memref<1x128xf32, #tpu.memory_space<vmem>>, %arg11: memref<16x128xf32, #tpu.memory_space<vmem>>, %arg12: memref<16x128xf32, #tpu.memory_space<vmem>>) attributes {dimension_semantics = [#tpu.dimension_semantics<parallel>, #tpu.dimension_semantics<arbitrary>], iteration_bounds = array<i64: 1, 1>, scalar_prefetch = 0 : i64, scratch_operands = 1 : i64, tpu.core_type = #tpu.core_type<tc>, window_params = [{transform_indices = @transform_0, window_bounds = array<i64: 16, 128>}, {transform_indices = @transform_1, window_bounds = array<i64: 128, 128>}, {pipeline_mode = #tpu.pipeline_mode<synchronous>, transform_indices = @transform_2, window_bounds = array<i64: 1, 128>}, {pipeline_mode = #tpu.pipeline_mode<synchronous>, transform_indices = @transform_3, window_bounds = array<i64: 1, 128, 256>}, {pipeline_mode = #tpu.pipeline_mode<synchronous>, transform_indices = @transform_4, window_bounds = array<i64: 1, 256>}, {pipeline_mode = #tpu.pipeline_mode<synchronous>, transform_indices = @transform_5, window_bounds = array<i64: 256, 128>}, {pipeline_mode = #tpu.pipeline_mode<synchronous>, transform_indices = @transform_6, window_bounds = array<i64: 1, 128>}, {pipeline_mode = #tpu.pipeline_mode<synchronous>, transform_indices = @transform_7, window_bounds = array<i64: 128, 128>}, {pipeline_mode = #tpu.pipeline_mode<synchronous>, transform_indices = @transform_8, window_bounds = array<i64: 1, 128>}, {transform_indices = @transform_9, window_bounds = array<i64: 16, 128>}]} {
    %c0_i32 = arith.constant 0 : i32
    %0 = arith.cmpi eq, %arg1, %c0_i32 : i32
    %1 = arith.extui %0 : i1 to i32
    %c0_i32_0 = arith.constant 0 : i32
    %2 = arith.cmpi ne, %1, %c0_i32_0 : i32
    scf.if %2 {
      %cst_10 = arith.constant 0.000000e+00 : f32
      %12 = vector.broadcast %cst_10 : f32 to vector<16x128xf32>
      %c0_11 = arith.constant 0 : index
      %c0_12 = arith.constant 0 : index
      %13 = vector.load %arg12[%c0_11, %c0_12] : memref<16x128xf32, #tpu.memory_space<vmem>>, vector<16x128xf32>
      tpu.vector_store %arg12[%c0_11, %c0_12], %12 {strides = array<i32>} : memref<16x128xf32, #tpu.memory_space<vmem>>, vector<16x128xf32>,
    } else {
    }
    %c0 = arith.constant 0 : index
    %c0_1 = arith.constant 0 : index
    %3 = vector.load %arg12[%c0, %c0_1] : memref<16x128xf32, #tpu.memory_space<vmem>>, vector<16x128xf32>
    %c0_2 = arith.constant 0 : index
    %c0_3 = arith.constant 0 : index
    %4 = vector.load %arg2[%c0_2, %c0_3] : memref<16x128xbf16, #tpu.memory_space<vmem>>, vector<16x128xbf16>
    %c0_4 = arith.constant 0 : index
    %c0_5 = arith.constant 0 : index
    %5 = vector.load %arg3[%c0_4, %c0_5] : memref<128x128xbf16, #tpu.memory_space<vmem>>, vector<128x128xbf16>
    %cst = arith.constant dense<0.000000e+00> : vector<16x128xf32>
    %6 = tpu.matmul %4, %5, %cst {dimension_numbers = #tpu.dot_dimension_numbers<[1], [0], [0], [1], [0, 0, 1, 1], [], []>} : vector<16x128xbf16>, vector<128x128xbf16>, vector<16x128xf32> -> vector<16x128xf32>
    %7 = arith.addf %3, %6 : vector<16x128xf32>
    %c0_6 = arith.constant 0 : index
    %c0_7 = arith.constant 0 : index
    %8 = vector.load %arg12[%c0_6, %c0_7] : memref<16x128xf32, #tpu.memory_space<vmem>>, vector<16x128xf32>
    tpu.vector_store %arg12[%c0_6, %c0_7], %7 {strides = array<i32>} : memref<16x128xf32, #tpu.memory_space<vmem>>, vector<16x128xf32>,
    %c0_i32_8 = arith.constant 0 : i32
    %9 = arith.cmpi eq, %arg1, %c0_i32_8 : i32
    %10 = arith.extui %9 : i1 to i32
    %c0_i32_9 = arith.constant 0 : i32
    %11 = arith.cmpi ne, %10, %c0_i32_9 : i32
    scf.if %11 {
      %c0_10 = arith.constant 0 : index
      %c0_11 = arith.constant 0 : index
      %12 = vector.load %arg12[%c0_10, %c0_11] : memref<16x128xf32, #tpu.memory_space<vmem>>, vector<16x128xf32>
      %c0_12 = arith.constant 0 : index
      %c0_13 = arith.constant 0 : index
      %13 = vector.load %arg4[%c0_12, %c0_13] : memref<1x128xf32, #tpu.memory_space<vmem>>, vector<1x128xf32>
      %14 = vector.broadcast %13 : vector<1x128xf32> to vector<16x128xf32>
      %15 = arith.addf %12, %14 : vector<16x128xf32>
      %16 = arith.truncf %15 : vector<16x128xf32> to vector<16x128xbf16>
      %c0_14 = arith.constant 0 : index
      %c0_15 = arith.constant 0 : index
      %c0_16 = arith.constant 0 : index
      %17 = vector.load %arg5[%c0_14, %c0_15, %c0_16] : memref<1x128x256xbf16, #tpu.memory_space<vmem>>, vector<1x128x256xbf16>
      %18 = vector.shape_cast %17 : vector<1x128x256xbf16> to vector<128x256xbf16>
      %cst_17 = arith.constant dense<0.000000e+00> : vector<16x256xf32>
      %19 = tpu.matmul %16, %18, %cst_17 {dimension_numbers = #tpu.dot_dimension_numbers<[1], [0], [0], [1], [0, 0, 1, 1], [], []>} : vector<16x128xbf16>, vector<128x256xbf16>, vector<16x256xf32> -> vector<16x256xf32>
      %c0_18 = arith.constant 0 : index
      %c0_19 = arith.constant 0 : index
      %20 = vector.load %arg6[%c0_18, %c0_19] : memref<1x256xf32, #tpu.memory_space<vmem>>, vector<1x256xf32>
      %21 = vector.broadcast %20 : vector<1x256xf32> to vector<16x256xf32>
      %22 = arith.addf %19, %21 : vector<16x256xf32>
      %23 = arith.truncf %22 : vector<16x256xf32> to vector<16x256xbf16>
      %c0_20 = arith.constant 0 : index
      %c0_21 = arith.constant 0 : index
      %24 = vector.load %arg7[%c0_20, %c0_21] : memref<256x128xbf16, #tpu.memory_space<vmem>>, vector<256x128xbf16>
      %cst_22 = arith.constant dense<0.000000e+00> : vector<16x128xf32>
      %25 = tpu.matmul %23, %24, %cst_22 {dimension_numbers = #tpu.dot_dimension_numbers<[1], [0], [0], [1], [0, 0, 1, 1], [], []>} : vector<16x256xbf16>, vector<256x128xbf16>, vector<16x128xf32> -> vector<16x128xf32>
      %c0_23 = arith.constant 0 : index
      %c0_24 = arith.constant 0 : index
      %26 = vector.load %arg8[%c0_23, %c0_24] : memref<1x128xf32, #tpu.memory_space<vmem>>, vector<1x128xf32>
      %27 = vector.broadcast %26 : vector<1x128xf32> to vector<16x128xf32>
      %28 = arith.addf %25, %27 : vector<16x128xf32>
      %cst_25 = arith.constant 0.000000e+00 : f32
      %29 = vector.broadcast %cst_25 : f32 to vector<16x128xf32>
      %30 = arith.maximumf %28, %29 : vector<16x128xf32>
      %31 = arith.truncf %30 : vector<16x128xf32> to vector<16x128xbf16>
      %c0_26 = arith.constant 0 : index
      %c0_27 = arith.constant 0 : index
      %32 = vector.load %arg9[%c0_26, %c0_27] : memref<128x128xbf16, #tpu.memory_space<vmem>>, vector<128x128xbf16>
      %cst_28 = arith.constant dense<0.000000e+00> : vector<16x128xf32>
      %33 = tpu.matmul %31, %32, %cst_28 {dimension_numbers = #tpu.dot_dimension_numbers<[1], [0], [0], [1], [0, 0, 1, 1], [], []>} : vector<16x128xbf16>, vector<128x128xbf16>, vector<16x128xf32> -> vector<16x128xf32>
      %c0_29 = arith.constant 0 : index
      %c0_30 = arith.constant 0 : index
      %34 = vector.load %arg10[%c0_29, %c0_30] : memref<1x128xf32, #tpu.memory_space<vmem>>, vector<1x128xf32>
      %35 = vector.broadcast %34 : vector<1x128xf32> to vector<16x128xf32>
      %36 = arith.addf %33, %35 : vector<16x128xf32>
      %c0_31 = arith.constant 0 : index
      %c0_32 = arith.constant 0 : index
      %37 = vector.load %arg11[%c0_31, %c0_32] : memref<16x128xf32, #tpu.memory_space<vmem>>, vector<16x128xf32>
      tpu.vector_store %arg11[%c0_31, %c0_32], %36 {strides = array<i32>} : memref<16x128xf32, #tpu.memory_space<vmem>>, vector<16x128xf32>,
    } else {
    }
    return
  }
  func.func @transform_0(%arg0: i32, %arg1: i32) -> (i32, i32) {
    %c0_i32 = arith.constant 0 : i32
    return %arg0, %arg1 : i32, i32
  }
  func.func @transform_1(%arg0: i32, %arg1: i32) -> (i32, i32) {
    %c0_i32 = arith.constant 0 : i32
    %c0_i32_0 = arith.constant 0 : i32
    return %arg1, %c0_i32 : i32, i32
  }
  func.func @transform_2(%arg0: i32, %arg1: i32) -> (i32, i32) {
    %c0_i32 = arith.constant 0 : i32
    %c0_i32_0 = arith.constant 0 : i32
    %c0_i32_1 = arith.constant 0 : i32
    return %c0_i32, %c0_i32_0 : i32, i32
  }
  func.func @transform_3(%arg0: i32, %arg1: i32) -> (i32, i32, i32) {
    %c0_i32 = arith.constant 0 : i32
    %c0_i32_0 = arith.constant 0 : i32
    %c0_i32_1 = arith.constant 0 : i32
    %c0_i32_2 = arith.constant 0 : i32
    return %c0_i32, %c0_i32_0, %c0_i32_1 : i32, i32, i32
  }
  func.func @transform_4(%arg0: i32, %arg1: i32) -> (i32, i32) {
    %c0_i32 = arith.constant 0 : i32
    %c0_i32_0 = arith.constant 0 : i32
    %c0_i32_1 = arith.constant 0 : i32
    return %c0_i32, %c0_i32_0 : i32, i32
  }
  func.func @transform_5(%arg0: i32, %arg1: i32) -> (i32, i32) {
    %c0_i32 = arith.constant 0 : i32
    %c0_i32_0 = arith.constant 0 : i32
    %c0_i32_1 = arith.constant 0 : i32
    return %c0_i32, %c0_i32_0 : i32, i32
  }
  func.func @transform_6(%arg0: i32, %arg1: i32) -> (i32, i32) {
    %c0_i32 = arith.constant 0 : i32
    %c0_i32_0 = arith.constant 0 : i32
    %c0_i32_1 = arith.constant 0 : i32
    return %c0_i32, %c0_i32_0 : i32, i32
  }
  func.func @transform_7(%arg0: i32, %arg1: i32) -> (i32, i32) {
    %c0_i32 = arith.constant 0 : i32
    %c0_i32_0 = arith.constant 0 : i32
    %c0_i32_1 = arith.constant 0 : i32
    return %c0_i32, %c0_i32_0 : i32, i32
  }
  func.func @transform_8(%arg0: i32, %arg1: i32) -> (i32, i32) {
    %c0_i32 = arith.constant 0 : i32
    %c0_i32_0 = arith.constant 0 : i32
    %c0_i32_1 = arith.constant 0 : i32
    return %c0_i32, %c0_i32_0 : i32, i32
  }
  func.func @transform_9(%arg0: i32, %arg1: i32) -> (i32, i32) {
    %c0_i32 = arith.constant 0 : i32
    %c0_i32_0 = arith.constant 0 : i32
    return %arg0, %c0_i32 : i32, i32
  }
}

</mosaic_0001>

<bundles_post_ra>
// kernel: tpu_custom_call.1
= control target key start
LH: loop header
LB: loop body
LE: loop exit
PB: predicated region body
PF: predicated region fallthrough
CT: control target
= control target key end

     0   :  { %14 = vsyncpa [#allocation4], 0  ;;  %s1248_s0 = inlined_call_operand.hbm [shape: bf16[16,128], index: 0, kind: input, shape index: {}]   ;;  %s1249_s1 = inlined_call_operand.hbm [shape: bf16[128,128], index: 1, kind: input, shape index: {}]   ;;  %s1250_s2 = inlined_call_operand.vmem [shape: f32[1,128], index: 2, kind: input, shape index: {}]   ;;  %s1251_s3 = inlined_call_operand.hbm [shape: bf16[1,128,256], index: 3, kind: input, shape index: {}]   ;;  %s1252_s4 = inlined_call_operand.vmem [shape: f32[1,256], index: 4, kind: input, shape index: {}]   ;;  %s1253_s5 = inlined_call_operand.hbm [shape: bf16[256,128], index: 5, kind: input, shape index: {}]   ;;  %s1254_s6 = inlined_call_operand.vmem [shape: f32[1,128], index: 6, kind: input, shape index: {}]   ;;  %s1255_s7 = inlined_call_operand.hbm [shape: bf16[128,128], index: 7, kind: input, shape index: {}]   ;;  %s1256_s8 = inlined_call_operand.vmem [shape: f32[1,128], index: 8, kind: input, shape index: {}]   ;;  %s1257_s9 = inlined_call_operand.hbm [shape: f32[16,128], index: 9, kind: output, shape index: {}]  }
   0x1   :  { %15 = vsyncpa [#allocation7], 0 }
   0x2   :  { %16 = vsyncpa [#allocation10], 0 }
   0x3   :  { %17 = vsyncpa [#allocation5], 0  ;;  %s1049_s30 = smov [#allocation6]   ;;  %s1050_s11 = smov [#allocation9]  }
   0x4   :  { %s35_s10 = sshll.u32 %s1049_s30, 4  ;;  %s63_s12 = sshll.u32 %s1050_s11, 4  ;;  %s36_s10 = int_to_ptr.vmem [resolvable:$true] %s35_s10  ;;  %s1112_s12 = int_to_ptr.vmem [resolvable:$true] %s63_s12 }
   0x5   :  { %s909_s15 = scalar_lea.hbm %s1249_s1, 1024 }
   0x6   :  { %p910_p0 = scmp.ne.s32.totalorder %s1249_s1, %s909_s15  ;;  %p913_p1 = scmp.lt.u32.totalorder %s909_s15, %s1249_s1 }
   0x8   :  { %p915_p2 = pnand %p913_p1, %p910_p0 }
   0xa   :  { %918 = shalt.err (!%p915_p2)
}
   0xb   :  { %s919_s20 = scalar_lea.vmem %s36_s10, 1024  ;;  %p924_p4 = scmp.lt.s32.totalorder %s36_s10, %s36_s10 }
   0xc   :  { %p920_p3 = scmp.ne.s32.totalorder %s36_s10, %s919_s20  ;;  %p925_p5 = scmp.lt.s32.totalorder %s919_s20, %s919_s20 }
   0xe   :  { %p926_p6 = por %p925_p5, %p924_p4 }
  0x10   :  { %p927_p7 = pnand %p926_p6, %p920_p3 }
  0x12   :  { %930 = shalt.err (!%p927_p7)
}
  0x13   :  { %s1051_s21 = smov 64   ;;  %s1052_s22 = smov 4  }
  0x14   :  { %41 = dma.hbm_to_vmem [thread:$0]  %s1249_s1, 1024, %s36_s10, [#allocation7], %s1051_s21, %s1051_s21, %s1052_s22  }
  0x15   :  { %s931_s27 = scalar_lea.hbm %s1253_s5, 2048 }
  0x16   :  { %p932_p8 = scmp.ne.s32.totalorder %s1253_s5, %s931_s27  ;;  %p935_p9 = scmp.lt.u32.totalorder %s931_s27, %s1253_s5 }
  0x18   :  { %p937_p10 = pnand %p935_p9, %p932_p8 }
  0x1a   :  { %940 = shalt.err (!%p937_p10)
}
  0x1b   :  { %s941_s13 = scalar_lea.vmem %s1112_s12, 2048  ;;  %p946_p12 = scmp.lt.s32.totalorder %s1112_s12, %s1112_s12 }
  0x1c   :  { %p942_p11 = scmp.ne.s32.totalorder %s1112_s12, %s941_s13  ;;  %p947_p13 = scmp.lt.s32.totalorder %s941_s13, %s941_s13 }
  0x1e   :  { %p948_p0 = por %p947_p13, %p946_p12 }
  0x20   :  { %p949_p1 = pnand %p948_p0, %p942_p11 }
  0x22   :  { %952 = shalt.err (!%p949_p1)
}
  0x23   :  { %69 = dma.hbm_to_vmem [thread:$0]  %s1253_s5, 2048, %s1112_s12, [#allocation10], %s1051_s21, %s1051_s21, %s1052_s22  }
  0x24   :  { %s1053_s14 = smov [#allocation3]   ;;  %s1054_s16 = smov [#allocation8]  }
  0x25   :  { %s23_s15 = sshll.u32 %s1053_s14, 4  ;;  %s49_s17 = sshll.u32 %s1054_s16, 4  ;;  %s24_s15 = int_to_ptr.vmem [resolvable:$true] %s23_s15  ;;  %s1149_s17 = int_to_ptr.vmem [resolvable:$true] %s49_s17 }
  0x26   :  { %s953_s20 = scalar_lea.hbm %s1248_s0, 128 }
  0x27   :  { %p954_p2 = scmp.ne.s32.totalorder %s1248_s0, %s953_s20  ;;  %p957_p3 = scmp.lt.u32.totalorder %s953_s20, %s1248_s0 }
  0x29   :  { %p959_p4 = pnand %p957_p3, %p954_p2 }
  0x2b   :  { %962 = shalt.err (!%p959_p4)
}
  0x2c   :  { %s963_s5 = scalar_lea.vmem %s24_s15, 128  ;;  %p968_p6 = scmp.lt.s32.totalorder %s24_s15, %s24_s15 }
  0x2d   :  { %p964_p5 = scmp.ne.s32.totalorder %s24_s15, %s963_s5  ;;  %p969_p7 = scmp.lt.s32.totalorder %s963_s5, %s963_s5 }
  0x2f   :  { %p970_p8 = por %p969_p7, %p968_p6 }
  0x31   :  { %p971_p9 = pnand %p970_p8, %p964_p5 }
  0x33   :  { %974 = shalt.err (!%p971_p9)
}
  0x34   :  { %29 = dma.hbm_to_vmem [thread:$0]  %s1248_s0, 128, %s24_s15, [#allocation4], %s1051_s21, %s1051_s21, %s1052_s22  }
  0x35   :  { %s975_s30 = scalar_lea.hbm %s1251_s3, 2048 }
  0x36   :  { %p976_p10 = scmp.ne.s32.totalorder %s1251_s3, %s975_s30  ;;  %p979_p11 = scmp.lt.u32.totalorder %s975_s30, %s1251_s3 }
  0x38   :  { %p981_p12 = pnand %p979_p11, %p976_p10 }
  0x3a   :  { %984 = shalt.err (!%p981_p12)
}
  0x3b   :  { %s985_s14 = scalar_lea.vmem %s1149_s17, 2048  ;;  %p990_p0 = scmp.lt.s32.totalorder %s1149_s17, %s1149_s17 }
  0x3c   :  { %p986_p13 = scmp.ne.s32.totalorder %s1149_s17, %s985_s14  ;;  %p991_p1 = scmp.lt.s32.totalorder %s985_s14, %s985_s14 }
  0x3e   :  { %p992_p2 = por %p991_p1, %p990_p0 }
  0x40   :  { %p993_p3 = pnand %p992_p2, %p986_p13 }
  0x42   :  { %996 = shalt.err (!%p993_p3)
}
  0x43   :  { %s1055_s0 = smov 128   ;;  %s1056_s15 = smov 8  }
  0x44   :  { %55 = dma.hbm_to_vmem [thread:$0]  %s1251_s3, 2048, %s1149_s17, [#allocation7], %s1055_s0, %s1055_s0, %s1056_s15  }
  0x45   :  { %s1057_s19 = smov [#allocation11]   ;;  %s997_s25 = scalar_lea.hbm %s1255_s7, 1024 }
  0x46   :  { %s77_s20 = sshll.u32 %s1057_s19, 4  ;;  %p998_p4 = scmp.ne.s32.totalorder %s1255_s7, %s997_s25  ;;  %s78_s20 = int_to_ptr.vmem [resolvable:$true] %s77_s20 }
  0x47   :  { %p1001_p5 = scmp.lt.u32.totalorder %s997_s25, %s1255_s7 }
  0x49   :  { %p1003_p6 = pnand %p1001_p5, %p998_p4 }
  0x4b   :  { %1006 = shalt.err (!%p1003_p6)
}
  0x4c   :  { %s1007_s28 = scalar_lea.vmem %s78_s20, 1024  ;;  %p1012_p8 = scmp.lt.s32.totalorder %s78_s20, %s78_s20 }
  0x4d   :  { %p1008_p7 = scmp.ne.s32.totalorder %s78_s20, %s1007_s28  ;;  %p1013_p9 = scmp.lt.s32.totalorder %s1007_s28, %s1007_s28 }
  0x4f   :  { %p1014_p10 = por %p1013_p9, %p1012_p8 }
  0x51   :  { %p1015_p11 = pnand %p1014_p10, %p1008_p7 }
  0x53   :  { %1018 = shalt.err (!%p1015_p11)
}
  0x54   :  { %83 = dma.hbm_to_vmem [thread:$0]  %s1255_s7, 1024, %s78_s20, [#allocation10], %s1051_s21, %s1051_s21, %s1052_s22  }
  0x55   :  { %1041 = dma.done.wait [#allocation4], 128  }
  0x56   :  { %1042 = vsyncadd [#allocation4], 4294967168 }
  0x57   :  { %1043 = dma.done.wait [#allocation7], 3072  }
  0x58   :  { %1044 = vsyncadd [#allocation7], 4294964224 }
  0x59   :  { %1045 = dma.done.wait [#allocation10], 3072  }
  0x5a   :  { %1046 = vsyncadd [#allocation10], 4294964224  ;;  %v1058_v0 = vmov 0.0   ;;  %vm1059_vm0 = vmmov 0   ;;  %v852_v1 = vld [vmem:[#allocation6] sm:$0xff]   ;;  %v853_v2 = vld [vmem:[#allocation6 + $0x8] sm:$0xff]   ;;  %v260_v56 = vlaneseq }
  0x5b   :  { %799 = vmatprep.subr.bf16.mxu0 %v1058_v0  ;;  %815 = vmatprep.mubr.msk.bf16.mxu0 %vm1059_vm0, %v1058_v0  ;;  %v854_v3 = vld [vmem:[#allocation6 + $0x10] sm:$0xff]   ;;  %v855_v4 = vld [vmem:[#allocation6 + $0x18] sm:$0xff]   ;;  %v861_v5 = vld [vmem:[#allocation8 + $0x4] ss:$8 sps:$4 sm:$0xff]   ;;  %v1060_v26 = vmov 0   ;;  %s1061_s13 = smov [#allocation12]  }
  0x5c   :  { %800 = vmatpush3.bf16.msra.mxu0 %v852_v1  ;;  %v863_v6 = vld [vmem:[#allocation8] ss:$8 sps:$4 sm:$0xff]   ;;  %350 = vmatprep.subr.bf16.mxu1 %v861_v5  ;;  %v864_v7 = vld [vmem:[#allocation8 + $0x14] ss:$8 sps:$4 sm:$0xff]   ;;  %v866_v8 = vld [vmem:[#allocation8 + $0x10] ss:$8 sps:$4 sm:$0xff]  }
  0x5d   :  { %801 = vmatprep.subr.bf16.mxu0 %v1058_v0  ;;  %351 = vmatpush1.bf16.msra.mxu1 %v863_v6  ;;  %v867_v9 = vld [vmem:[#allocation8 + $0x24] ss:$8 sps:$4 sm:$0xff]   ;;  %v869_v12 = vld [vmem:[#allocation8 + $0x20] ss:$8 sps:$4 sm:$0xff]   ;;  %v870_v13 = vld [vmem:[#allocation8 + $0x34] ss:$8 sps:$4 sm:$0xff]  }
  0x5e   :  { %352 = vmatprep.subr.bf16.mxu1 %v864_v7  ;;  %v856_v10 = vld [vmem:[#allocation6 + $0x20] sm:$0xff]   ;;  %v857_v11 = vld [vmem:[#allocation6 + $0x28] sm:$0xff]   ;;  %v872_v14 = vld [vmem:[#allocation8 + $0x30] ss:$8 sps:$4 sm:$0xff]   ;;  %382 = vmatprep.mubr.bf16.mxu1 %v1060_v26  ;;  %v261_v57 = vshrl.u32 %v260_v56, 7  ;;  %s693_s1 = sshll.u32 %s1061_s13, 4  ;;  %s694_s1 = int_to_ptr.vmem [resolvable:$true] %s693_s1 }
  0x5f   :  { %v873_v15 = vld [vmem:[#allocation8 + $0x44] ss:$8 sps:$4 sm:$0xff]   ;;  %v858_v16 = vld [vmem:[#allocation6 + $0x30] sm:$0xff]   ;;  %v875_v17 = vld [vmem:[#allocation8 + $0x40] ss:$8 sps:$4 sm:$0xff]   ;;  %p1024_p13 = scmp.lt.s32.totalorder %s694_s1, %s694_s1 }
  0x60   :  { %802 = vmatpush3.bf16.msra.mxu0 %v853_v2  ;;  %v876_v18 = vld [vmem:[#allocation8 + $0x54] ss:$8 sps:$4 sm:$0xff]   ;;  %v878_v20 = vld [vmem:[#allocation8 + $0x50] ss:$8 sps:$4 sm:$0xff]   ;;  %v879_v22 = vld [vmem:[#allocation8 + $0x64] ss:$8 sps:$4 sm:$0xff]  }
  0x61   :  { %803 = vmatprep.subr.bf16.mxu0 %v1058_v0  ;;  %353 = vmatpush1.bf16.msra.mxu1 %v866_v8  ;;  %v859_v19 = vld [vmem:[#allocation6 + $0x38] sm:$0xff]   ;;  %v881_v23 = vld [vmem:[#allocation8 + $0x60] ss:$8 sps:$4 sm:$0xff]   ;;  %v889_v31 = vld [vmem:[#allocation9 + $0x50] sm:$0xff]   ;;  %v262_v58 = vsub.s32 0, %v261_v57  ;;  %v266_v60 = vsub.s32 1, %v261_v57 }
  0x62   :  { %354 = vmatprep.subr.bf16.mxu1 %v867_v9  ;;  %v860_v21 = vld [vmem:[#allocation3] sm:$0xff]   ;;  %v885_v27 = vld [vmem:[#allocation9 + $0x40] sm:$0xff]   ;;  %v887_v29 = vld [vmem:[#allocation9 + $0x48] sm:$0xff]  }
  0x63   :  { %v882_v24 = vld [vmem:[#allocation8 + $0x74] ss:$8 sps:$4 sm:$0xff]   ;;  %v884_v25 = vld [vmem:[#allocation8 + $0x70] ss:$8 sps:$4 sm:$0xff]   ;;  %v886_v28 = vld [vmem:[#allocation9] sm:$0xff]  }
  0x64   :  { %804 = vmatpush3.bf16.msra.mxu0 %v854_v3  ;;  %v888_v30 = vld [vmem:[#allocation9 + $0x8] sm:$0xff]   ;;  %v890_v32 = vld [vmem:[#allocation9 + $0x10] sm:$0xff]   ;;  %v891_v33 = vld [vmem:[#allocation9 + $0x58] sm:$0xff]  }
  0x65   :  { %805 = vmatprep.subr.bf16.mxu0 %v1058_v0  ;;  %355 = vmatpush1.bf16.msra.mxu1 %v869_v12  ;;  %v892_v34 = vld [vmem:[#allocation9 + $0x18] sm:$0xff]   ;;  %v893_v35 = vld [vmem:[#allocation9 + $0x60] sm:$0xff]   ;;  %v895_v37 = vld [vmem:[#allocation9 + $0x68] sm:$0xff]  }
  0x66   :  { %356 = vmatprep.subr.bf16.mxu1 %v870_v13  ;;  %v894_v36 = vld [vmem:[#allocation9 + $0x20] sm:$0xff]   ;;  %v896_v38 = vld [vmem:[#allocation9 + $0x28] sm:$0xff]   ;;  %v716_v40 = vld [vmem:[%s1250_s2] ss:$0 sm:$0xff] }
  0x67   :  { %v897_v47 = vld [vmem:[#allocation9 + $0x70] sm:$0xff]   ;;  %v899_v49 = vld [vmem:[#allocation9 + $0x78] sm:$0xff]   ;;  %v901_v51 = vld [vmem:[#allocation11] sm:$0xff]  }
  0x68   :  { %806 = vmatpush3.bf16.msra.mxu0 %v855_v4  ;;  %v898_v48 = vld [vmem:[#allocation9 + $0x30] sm:$0xff]   ;;  %v900_v50 = vld [vmem:[#allocation9 + $0x38] sm:$0xff]   ;;  %v902_v52 = vld [vmem:[#allocation11 + $0x8] sm:$0xff]  }
  0x69   :  { %807 = vmatprep.subr.bf16.mxu0 %v1058_v0  ;;  %357 = vmatpush1.bf16.msra.mxu1 %v872_v14  ;;  %v903_v53 = vld [vmem:[#allocation11 + $0x10] sm:$0xff]   ;;  %v904_v54 = vld [vmem:[#allocation11 + $0x18] sm:$0xff]   ;;  %v905_v55 = vld [vmem:[#allocation11 + $0x20] sm:$0xff]  }
  0x6a   :  { %358 = vmatprep.subr.bf16.mxu1 %v873_v15  ;;  %v258_v59 = vld [vmem:[%s1252_s4] sm:$0x3] }
  0x6b   :  { %v263_v61 = vrot.slane %v258_v59, %v262_v58  ;;  %v267_v63 = vrot.slane %v258_v59, %v266_v60  ;;  %v908_v12 = vld [vmem:[#allocation11 + $0x38] sm:$0xff]  }
  0x6c   :  { %808 = vmatpush3.bf16.msra.mxu0 %v856_v10  ;;  %v906_v10 = vld [vmem:[#allocation11 + $0x28] sm:$0xff]   ;;  %v733_v14 = vld [vmem:[%s1254_s6] ss:$0 sm:$0xff]  ;;  %s1019_s6 = scalar_lea.vmem %s694_s1, 256 }
  0x6d   :  { %809 = vmatprep.subr.bf16.mxu0 %v1058_v0  ;;  %359 = vmatpush1.bf16.msra.mxu1 %v875_v17  ;;  %p1020_p12 = scmp.ne.s32.totalorder %s694_s1, %s1019_s6  ;;  %p1025_p0 = scmp.lt.s32.totalorder %s1019_s6, %s1019_s6 }
  0x6e   :  { %360 = vmatprep.subr.bf16.mxu1 %v876_v18 }
  0x6f   :  { %p1026_p1 = por %p1025_p0, %p1024_p13 }
  0x70   :  { %810 = vmatpush3.bf16.msra.mxu0 %v857_v11  ;;  %v907_v11 = vld [vmem:[#allocation11 + $0x30] sm:$0xff]  }
  0x71   :  { %811 = vmatprep.subr.bf16.mxu0 %v1058_v0  ;;  %361 = vmatpush1.bf16.msra.mxu1 %v878_v20  ;;  %p1027_p2 = pnand %p1026_p1, %p1020_p12 }
  0x72   :  { %362 = vmatprep.subr.bf16.mxu1 %v879_v22 }
  0x74   :  { %812 = vmatpush3.bf16.msra.mxu0 %v858_v16 }
  0x75   :  { %813 = vmatprep.subr.bf16.mxu0 %v1058_v0  ;;  %363 = vmatpush1.bf16.msra.mxu1 %v881_v23 }
  0x76   :  { %364 = vmatprep.subr.bf16.mxu1 %v882_v24 }
  0x78   :  { %814 = vmatpush3.bf16.msra.mxu0 %v859_v19 }
  0x79   :  { %365 = vmatpush1.bf16.msra.mxu1 %v884_v25  ;;  %768 = vmatprep.subr.bf16.mxu0 %v885_v27 }
  0x7a   :  { %819 = vmatprep.subr.bf16.mxu1 %v1058_v0 }
  0x7b   :  { %816 = vmatmul.mubr.bf16.vlgmr.msra.gmra.mrb[0].mxu0 %v860_v21 }
  0x7c   :  { %769 = vmatpush3.bf16.msra.mxu0 %v886_v28 }
  0x7d   :  { %770 = vmatprep.subr.bf16.mxu0 %v887_v29 }
  0x80   :  { %771 = vmatpush3.bf16.msra.mxu0 %v888_v30 }
  0x81   :  { %772 = vmatprep.subr.bf16.mxu0 %v889_v31 }
  0x84   :  { %773 = vmatpush3.bf16.msra.mxu0 %v890_v32 }
  0x85   :  { %774 = vmatprep.subr.bf16.mxu0 %v891_v33 }
  0x88   :  { %775 = vmatpush3.bf16.msra.mxu0 %v892_v34 }
  0x89   :  { %776 = vmatprep.subr.bf16.mxu0 %v893_v35 }
  0x8c   :  { %777 = vmatpush3.bf16.msra.mxu0 %v894_v36 }
  0x8d   :  { %778 = vmatprep.subr.bf16.mxu0 %v895_v37 }
  0x90   :  { %779 = vmatpush3.bf16.msra.mxu0 %v896_v38 }
  0x91   :  { %780 = vmatprep.subr.bf16.mxu0 %v897_v47 }
  0x94   :  { %781 = vmatpush3.bf16.msra.mxu0 %v898_v48 }
  0x95   :  { %782 = vmatprep.subr.bf16.mxu0 %v899_v49 }
  0x98   :  { %783 = vmatpush3.bf16.msra.mxu0 %v900_v50 }
 0x14e   :  { %v216_v39 = vpop.f32.mrb[0].mxu0 }
 0x14f   :  { %v817_v41 = vpop.f32.mrb[1].mxu0  ;;  %v239_v43 = vadd.f32 %v716_v40, %v216_v39 }
 0x150   :  { %v219_v42 = vpop.f32.mrb[2].mxu0 }
 0x151   :  { %v240_v44 = vadd.f32 %v716_v40, %v219_v42  ;;  %v818_v45 = vpop.f32.mrb[3].mxu0 }
 0x153   :  { %v241_v46 = vpack.c.bf16 %v240_v44, %v239_v43 }
 0x155   :  { %383 = vmatmul.mubr.bf16.vlgmr.msra.gmra.mrb[0].mxu1 %v241_v46 }
 0x156   :  { %835 = vmatprep.mubr.msk.bf16.mxu1 %vm1059_vm0, %v1058_v0  ;;  %820 = vmatpush3.bf16.msra.mxu1 %v901_v51 }
 0x157   :  { %821 = vmatprep.subr.bf16.mxu1 %v1058_v0 }
 0x15a   :  { %822 = vmatpush3.bf16.msra.mxu1 %v902_v52 }
 0x15b   :  { %823 = vmatprep.subr.bf16.mxu1 %v1058_v0 }
 0x15e   :  { %824 = vmatpush3.bf16.msra.mxu1 %v903_v53 }
 0x15f   :  { %825 = vmatprep.subr.bf16.mxu1 %v1058_v0 }
 0x162   :  { %826 = vmatpush3.bf16.msra.mxu1 %v904_v54 }
 0x163   :  { %827 = vmatprep.subr.bf16.mxu1 %v1058_v0 }
 0x166   :  { %828 = vmatpush3.bf16.msra.mxu1 %v905_v55 }
 0x167   :  { %829 = vmatprep.subr.bf16.mxu1 %v1058_v0 }
 0x16a   :  { %830 = vmatpush3.bf16.msra.mxu1 %v906_v10 }
 0x16b   :  { %831 = vmatprep.subr.bf16.mxu1 %v1058_v0 }
 0x16e   :  { %832 = vmatpush3.bf16.msra.mxu1 %v907_v11 }
 0x16f   :  { %833 = vmatprep.subr.bf16.mxu1 %v1058_v0  ;;  %v750_v0 = vld [vmem:[%s1256_s8] ss:$0 sm:$0xff] }
 0x172   :  { %834 = vmatpush3.bf16.msra.mxu1 %v908_v12 }
 0x228   :  { %v384_v62 = vpop.f32.mrb[0].mxu1 }
 0x229   :  { %v386_v1 = vpop.f32.mrb[1].mxu1  ;;  %v385_v3 = vadd.f32 %v384_v62, %v263_v61 }
 0x22a   :  { %v388_v2 = vpop.f32.mrb[2].mxu1  ;;  %v387_v6 = vadd.f32 %v386_v1, %v267_v63 }
 0x22b   :  { %v389_v4 = vadd.f32 %v388_v2, %v263_v61  ;;  %v390_v5 = vpop.f32.mrb[3].mxu1 }
 0x22c   :  { %v391_v7 = vadd.f32 %v390_v5, %v267_v63 }
 0x22d   :  { %v393_v8 = vpack.c.bf16 %v389_v4, %v385_v3 }
 0x22e   :  { %v394_v9 = vpack.c.bf16 %v391_v7, %v387_v6 }
 0x230   :  { %562 = vmatprep.mubr.bf16.mxu0 %v394_v9 }
 0x231   :  { %563 = vmatmul.mubr.bf16.vlgmr.msra.gmra.mrb[4].mxu0 %v393_v8 }
 0x304   :  { %v784_v13 = vpop.f32.mrb[4].mxu0 }
 0x305   :  { %v785_v15 = vpop.f32.mrb[5].mxu0 }
 0x306   :  { %v786_v16 = vadd.f32 %v785_v15, %v784_v13  ;;  %v787_v17 = vpop.f32.mrb[6].mxu0 }
 0x307   :  { %v788_v18 = vpop.f32.mrb[7].mxu0 }
 0x308   :  { %v565_v19 = vadd.f32 %v786_v16, %v733_v14  ;;  %v789_v20 = vadd.f32 %v788_v18, %v787_v17 }
 0x30a   :  { %v568_v21 = vadd.f32 %v789_v20, %v733_v14  ;;  %v571_v22 = vmax.f32 %v565_v19, 0.0 }
 0x30c   :  { %v572_v23 = vmax.f32 %v568_v21, 0.0 }
 0x30e   :  { %v573_v24 = vpack.c.bf16 %v572_v23, %v571_v22 }
 0x310   :  { %836 = vmatmul.mubr.bf16.vlgmr.msra.gmra.mrb[4].mxu1 %v573_v24 }
 0x3e3   :  { %v679_v25 = vpop.f32.mrb[4].mxu1 }
 0x3e4   :  { %v680_v26 = vadd.f32 %v750_v0, %v679_v25  ;;  %v837_v27 = vpop.f32.mrb[5].mxu1 }
 0x3e5   :  { %v682_v28 = vpop.f32.mrb[6].mxu1 }
 0x3e6   :  { %686 = vst [vmem:[#allocation12] sm:$0xff] %v680_v26  ;;  %v683_v29 = vadd.f32 %v750_v0, %v682_v28  ;;  %v838_v30 = vpop.f32.mrb[7].mxu1 }
 0x3e8   :  { %687 = vst [vmem:[#allocation12 + $0x8] sm:$0xff] %v683_v29 }
 0x3e9   :  { %1030 = shalt.err (!%p1027_p2)
}
 0x3ea   :  { %s1031_s14 = scalar_lea.hbm %s1257_s9, 256 }
 0x3eb   :  { %p1032_p3 = scmp.ne.s32.totalorder %s1257_s9, %s1031_s14  ;;  %p1035_p4 = scmp.lt.u32.totalorder %s1031_s14, %s1257_s9 }
 0x3ed   :  { %p1037_p5 = pnand %p1035_p4, %p1032_p3 }
 0x3ef   :  { %1040 = shalt.err (!%p1037_p5)
}
 0x3f0   :  { %699 = dma.vmem_to_hbm [thread:$0]  %s694_s1, 256, %s1257_s9, [#allocation5], %s1055_s0, %s1055_s0, %s1056_s15  }
 0x3f1   :  { %1047 = dma.done.wait [#allocation5], 256  }
 0x3f2   :  { %1048 = vsyncadd [#allocation5], 4294967040 }
 0x3f3   :  { %703 = vsyncpa [#allocation4], 1 }
 0x3f4   :  { %704 = vsyncpa [#allocation7], 1 }
 0x3f5   :  { %705 = vsyncpa [#allocation10], 1 }
 0x3f6   :  { %706 = vsyncpa [#allocation5], 1 }

</bundles_post_ra>
